<compile_context>
chip_gen: v6e
topology: v6e:2x2x1
jax: 0.10.0
libtpu: 0.0.40
codegen_flags: <defaults>
</compile_context>

<pallas_src>
import jax
import jax.numpy as jnp
from jax.experimental import pallas as pl
from jax.experimental.pallas import tpu as pltpu


def _rup8(n):
    return ((n + 7) // 8) * 8


def _make_lstm_kernel(T, I, H, O, offs):
    """Build the kernel with static layout constants baked in."""
    o_wih, o_whh, o_b, o_wfc, o_bfc = offs

    def kernel(x_ref, p_ref, out_ref):
        # Parameter slab sub-views (all segment row offsets are multiples of 8).
        wih = p_ref[o_wih:o_wih + I, :]      # (I, 4H)   gate order [i, f, g, o]
        whh = p_ref[o_whh:o_whh + H, :]      # (H, 4H)
        b = p_ref[o_b:o_b + 1, :]            # (1, 4H)   b_ih + b_hh
        wfc = p_ref[o_wfc:o_wfc + H, :]      # (H, 4H)   only lanes [0, O) non-zero
        bfc = p_ref[o_bfc:o_bfc + 1, :]      # (1, 4H)   only lanes [0, O) non-zero

        x = x_ref[...]                       # (B, T, I) ~2 KB, loaded once

        # Input->hidden projections for every timestep.  Independent of h, so
        # they all sit off the serial recurrence critical path.
        xg = [jnp.dot(x[:, t, :], wih, preferred_element_type=jnp.float32) + b
              for t in range(T)]             # T x (B, 4H)

        # ---- t = 0 (peeled: h = c = 0, no h@W_hh, no f*c) ----
        sig0 = jax.nn.sigmoid(xg[0])         # one EUP pass for i/f/o gates
        tg0 = jnp.tanh(xg[0])                # one EUP pass for g gate
        c = sig0[:, 0:H] * tg0[:, 2 * H:3 * H]            # i * g
        h = sig0[:, 3 * H:4 * H] * jnp.tanh(c)            # o * tanh(c)

        # ---- t = 1 .. T-1 (statically unrolled recurrence) ----
        for t in range(1, T):
            gates = xg[t] + jnp.dot(h, whh, preferred_element_type=jnp.float32)
            sig = jax.nn.sigmoid(gates)      # full (B, 4H) vreg: i, f, o at once
            tg = jnp.tanh(gates)             # full (B, 4H) vreg: g
            c = sig[:, H:2 * H] * c + sig[:, 0:H] * tg[:, 2 * H:3 * H]
            h = sig[:, 3 * H:4 * H] * jnp.tanh(c)

        # Final projection of h_T.  O (=8) < 128 lanes -> one masked store,
        # acceptable as a single one-time write.
        out = jnp.dot(h, wfc, preferred_element_type=jnp.float32) + bfc
        out_ref[...] = out[:, 0:O].astype(out_ref.dtype)

    return kernel


def pack_params(params):
    """One-time parameter prep: transpose / combine / pack into a single slab.

    Slab layout (rows; lane width = 4H; every segment start is a multiple of 8):
      [o_wih : o_wih+I]  w_ih.T       (I, 4H)
      [o_whh : o_whh+H]  w_hh.T       (H, 4H)
      [o_b]              b_ih + b_hh  (4H,)
      [o_wfc : o_wfc+H]  w_fc.T       (H, O)  zero-padded to 4H lanes
      [o_bfc]            b_fc         (O,)    zero-padded to 4H lanes
    """
    w_ih, w_hh, b_ih, b_hh, w_fc, b_fc = (
        params["w_ih"], params["w_hh"], params["b_ih"], params["b_hh"],
        params["w_fc"], params["b_fc"])
    H4, I = w_ih.shape
    H = H4 // 4
    O = w_fc.shape[0]
    assert O <= H4, "fc output width must fit inside the 4H-lane slab"

    o_wih = 0
    o_whh = o_wih + _rup8(I)
    o_b = o_whh + _rup8(H)
    o_wfc = o_b + 8
    o_bfc = o_wfc + _rup8(H)
    rows = o_bfc + 8

    slab = jnp.zeros((rows, H4), jnp.float32)
    slab = slab.at[o_wih:o_wih + I, :].set(w_ih.T.astype(jnp.float32))
    slab = slab.at[o_whh:o_whh + H, :].set(w_hh.T.astype(jnp.float32))
    slab = slab.at[o_b, :].set((b_ih + b_hh).astype(jnp.float32))
    slab = slab.at[o_wfc:o_wfc + H, :O].set(w_fc.T.astype(jnp.float32))
    slab = slab.at[o_bfc, :O].set(b_fc.astype(jnp.float32))

    meta = {"I": I, "H": H, "O": O, "offs": (o_wih, o_whh, o_b, o_wfc, o_bfc)}
    return slab, meta


def make_forward(meta):
    """Returns a jitted forward(x, param_slab) -> (B, O)."""
    H, O = meta["H"], meta["O"]
    offs = meta["offs"]
    vmem = pl.BlockSpec(memory_space=pltpu.MemorySpace.VMEM)

    def forward(x, param_slab):
        B, T, I = x.shape
        kernel = _make_lstm_kernel(T, I, H, O, offs)
        # Single invocation, no grid: the whole problem (~50 KB) is VMEM
        # resident on every TPU generation, so there is nothing to pipeline.
        return pl.pallas_call(
            kernel,
            out_shape=jax.ShapeDtypeStruct((B, O), jnp.float32),
            in_specs=[vmem, vmem],
            out_specs=vmem,
        )(x, param_slab)

    return jax.jit(forward)


def _reference_forward(x, params):
    """Pure-JAX reference matching torch.nn.LSTM + Linear semantics."""
    w_ih, w_hh, b_ih, b_hh, w_fc, b_fc = (
        params["w_ih"], params["w_hh"], params["b_ih"], params["b_hh"],
        params["w_fc"], params["b_fc"])
    B, T, I = x.shape
    H = w_hh.shape[1]

    def step(carry, x_t):
        h, c = carry
        gates = x_t @ w_ih.T + b_ih + h @ w_hh.T + b_hh
        i = jax.nn.sigmoid(gates[:, 0:H])
        f = jax.nn.sigmoid(gates[:, H:2 * H])
        g = jnp.tanh(gates[:, 2 * H:3 * H])
        o = jax.nn.sigmoid(gates[:, 3 * H:4 * H])
        c = f * c + i * g
        h = o * jnp.tanh(c)
        return (h, c), None

    h0 = jnp.zeros((B, H), jnp.float32)
    c0 = jnp.zeros((B, H), jnp.float32)
    (h_last, _), _ = jax.lax.scan(step, (h0, c0), jnp.transpose(x, (1, 0, 2)))
    return h_last @ w_fc.T + b_fc


def init_params(key, input_size, hidden_size, output_size):
    """Deterministic init mimicking PyTorch's U(-1/sqrt(H), 1/sqrt(H))."""
    H = hidden_size
    k = 1.0 / jnp.sqrt(jnp.float32(H))
    ks = jax.random.split(key, 6)
    u = lambda kk, shape: jax.random.uniform(kk, shape, jnp.float32, -k, k)
    return {
        "w_ih": u(ks[0], (4 * H, input_size)),
        "w_hh": u(ks[1], (4 * H, H)),
        "b_ih": u(ks[2], (4 * H,)),
        "b_hh": u(ks[3], (4 * H,)),
        "w_fc": u(ks[4], (output_size, H)),
        "b_fc": u(ks[5], (output_size,)),
    }


if __name__ == "__main__":
    # LightweightLSTM(input_size=16, hidden_size=32, output_size=8,
    #                 num_layers=1, width_multiplier=1.0)
    B, T, I, H, O = 4, 8, 16, 32, 8

    key = jax.random.PRNGKey(0)
    k_x, k_p = jax.random.split(key)
    x = jax.random.normal(k_x, (B, T, I), jnp.float32)
    params = init_params(k_p, I, H, O)

    # One-time parameter prep (init-time, NOT per forward call).
    param_slab, meta = pack_params(params)
    fwd = make_forward(meta)

    out = jax.block_until_ready(fwd(x, param_slab))

    ref = _reference_forward(x, params)
    assert out.shape == (B, O)
    assert jnp.allclose(out, ref, atol=1e-4, rtol=1e-4), "mismatch vs reference"

    print("KERNEL_OK")
</pallas_src>

<mosaic_0001>
module attributes {stable_mosaic.version = 11 : i64} {
  func.func @kernel(%arg0: memref<4x8x16xf32, #tpu.memory_space<vmem>>, %arg1: memref<96x128xf32, #tpu.memory_space<vmem>>, %arg2: memref<4x8xf32, #tpu.memory_space<vmem>>) attributes {dimension_semantics = [], scalar_prefetch = 0 : i64, scratch_operands = 0 : i64, tpu.core_type = #tpu.core_type<tc>} {
    %c0 = arith.constant 0 : index
    %c0_0 = arith.constant 0 : index
    %0 = vector.load %arg1[%c0, %c0_0] : memref<96x128xf32, #tpu.memory_space<vmem>>, vector<16x128xf32>
    %c16 = arith.constant 16 : index
    %c0_1 = arith.constant 0 : index
    %1 = vector.load %arg1[%c16, %c0_1] : memref<96x128xf32, #tpu.memory_space<vmem>>, vector<32x128xf32>
    %c48 = arith.constant 48 : index
    %c0_2 = arith.constant 0 : index
    %2 = vector.load %arg1[%c48, %c0_2] : memref<96x128xf32, #tpu.memory_space<vmem>>, vector<1x128xf32>
    %c56 = arith.constant 56 : index
    %c0_3 = arith.constant 0 : index
    %3 = vector.load %arg1[%c56, %c0_3] : memref<96x128xf32, #tpu.memory_space<vmem>>, vector<32x128xf32>
    %c88 = arith.constant 88 : index
    %c0_4 = arith.constant 0 : index
    %4 = vector.load %arg1[%c88, %c0_4] : memref<96x128xf32, #tpu.memory_space<vmem>>, vector<1x128xf32>
    %c0_5 = arith.constant 0 : index
    %c0_6 = arith.constant 0 : index
    %c0_7 = arith.constant 0 : index
    %5 = vector.load %arg0[%c0_5, %c0_6, %c0_7] : memref<4x8x16xf32, #tpu.memory_space<vmem>>, vector<4x8x16xf32>
    %6 = vector.extract_strided_slice %5 {offsets = [0, 0, 0], sizes = [4, 1, 16], strides = [1, 1, 1]} : vector<4x8x16xf32> to vector<4x1x16xf32>
    %7 = vector.shape_cast %6 : vector<4x1x16xf32> to vector<4x16xf32>
    %cst = arith.constant dense<0.000000e+00> : vector<4x128xf32>
    %8 = tpu.matmul %7, %0, %cst {dimension_numbers = #tpu.dot_dimension_numbers<[1], [0], [0], [1], [0, 0, 1, 1], [], []>} : vector<4x16xf32>, vector<16x128xf32>, vector<4x128xf32> -> vector<4x128xf32>
    %9 = vector.broadcast %2 : vector<1x128xf32> to vector<4x128xf32>
    %10 = arith.addf %8, %9 : vector<4x128xf32>
    %11 = vector.extract_strided_slice %5 {offsets = [0, 1, 0], sizes = [4, 1, 16], strides = [1, 1, 1]} : vector<4x8x16xf32> to vector<4x1x16xf32>
    %12 = vector.shape_cast %11 : vector<4x1x16xf32> to vector<4x16xf32>
    %cst_8 = arith.constant dense<0.000000e+00> : vector<4x128xf32>
    %13 = tpu.matmul %12, %0, %cst_8 {dimension_numbers = #tpu.dot_dimension_numbers<[1], [0], [0], [1], [0, 0, 1, 1], [], []>} : vector<4x16xf32>, vector<16x128xf32>, vector<4x128xf32> -> vector<4x128xf32>
    %14 = vector.broadcast %2 : vector<1x128xf32> to vector<4x128xf32>
    %15 = arith.addf %13, %14 : vector<4x128xf32>
    %16 = vector.extract_strided_slice %5 {offsets = [0, 2, 0], sizes = [4, 1, 16], strides = [1, 1, 1]} : vector<4x8x16xf32> to vector<4x1x16xf32>
    %17 = vector.shape_cast %16 : vector<4x1x16xf32> to vector<4x16xf32>
    %cst_9 = arith.constant dense<0.000000e+00> : vector<4x128xf32>
    %18 = tpu.matmul %17, %0, %cst_9 {dimension_numbers = #tpu.dot_dimension_numbers<[1], [0], [0], [1], [0, 0, 1, 1], [], []>} : vector<4x16xf32>, vector<16x128xf32>, vector<4x128xf32> -> vector<4x128xf32>
    %19 = vector.broadcast %2 : vector<1x128xf32> to vector<4x128xf32>
    %20 = arith.addf %18, %19 : vector<4x128xf32>
    %21 = vector.extract_strided_slice %5 {offsets = [0, 3, 0], sizes = [4, 1, 16], strides = [1, 1, 1]} : vector<4x8x16xf32> to vector<4x1x16xf32>
    %22 = vector.shape_cast %21 : vector<4x1x16xf32> to vector<4x16xf32>
    %cst_10 = arith.constant dense<0.000000e+00> : vector<4x128xf32>
    %23 = tpu.matmul %22, %0, %cst_10 {dimension_numbers = #tpu.dot_dimension_numbers<[1], [0], [0], [1], [0, 0, 1, 1], [], []>} : vector<4x16xf32>, vector<16x128xf32>, vector<4x128xf32> -> vector<4x128xf32>
    %24 = vector.broadcast %2 : vector<1x128xf32> to vector<4x128xf32>
    %25 = arith.addf %23, %24 : vector<4x128xf32>
    %26 = vector.extract_strided_slice %5 {offsets = [0, 4, 0], sizes = [4, 1, 16], strides = [1, 1, 1]} : vector<4x8x16xf32> to vector<4x1x16xf32>
    %27 = vector.shape_cast %26 : vector<4x1x16xf32> to vector<4x16xf32>
    %cst_11 = arith.constant dense<0.000000e+00> : vector<4x128xf32>
    %28 = tpu.matmul %27, %0, %cst_11 {dimension_numbers = #tpu.dot_dimension_numbers<[1], [0], [0], [1], [0, 0, 1, 1], [], []>} : vector<4x16xf32>, vector<16x128xf32>, vector<4x128xf32> -> vector<4x128xf32>
    %29 = vector.broadcast %2 : vector<1x128xf32> to vector<4x128xf32>
    %30 = arith.addf %28, %29 : vector<4x128xf32>
    %31 = vector.extract_strided_slice %5 {offsets = [0, 5, 0], sizes = [4, 1, 16], strides = [1, 1, 1]} : vector<4x8x16xf32> to vector<4x1x16xf32>
    %32 = vector.shape_cast %31 : vector<4x1x16xf32> to vector<4x16xf32>
    %cst_12 = arith.constant dense<0.000000e+00> : vector<4x128xf32>
    %33 = tpu.matmul %32, %0, %cst_12 {dimension_numbers = #tpu.dot_dimension_numbers<[1], [0], [0], [1], [0, 0, 1, 1], [], []>} : vector<4x16xf32>, vector<16x128xf32>, vector<4x128xf32> -> vector<4x128xf32>
    %34 = vector.broadcast %2 : vector<1x128xf32> to vector<4x128xf32>
    %35 = arith.addf %33, %34 : vector<4x128xf32>
    %36 = vector.extract_strided_slice %5 {offsets = [0, 6, 0], sizes = [4, 1, 16], strides = [1, 1, 1]} : vector<4x8x16xf32> to vector<4x1x16xf32>
    %37 = vector.shape_cast %36 : vector<4x1x16xf32> to vector<4x16xf32>
    %cst_13 = arith.constant dense<0.000000e+00> : vector<4x128xf32>
    %38 = tpu.matmul %37, %0, %cst_13 {dimension_numbers = #tpu.dot_dimension_numbers<[1], [0], [0], [1], [0, 0, 1, 1], [], []>} : vector<4x16xf32>, vector<16x128xf32>, vector<4x128xf32> -> vector<4x128xf32>
    %39 = vector.broadcast %2 : vector<1x128xf32> to vector<4x128xf32>
    %40 = arith.addf %38, %39 : vector<4x128xf32>
    %41 = vector.extract_strided_slice %5 {offsets = [0, 7, 0], sizes = [4, 1, 16], strides = [1, 1, 1]} : vector<4x8x16xf32> to vector<4x1x16xf32>
    %42 = vector.shape_cast %41 : vector<4x1x16xf32> to vector<4x16xf32>
    %cst_14 = arith.constant dense<0.000000e+00> : vector<4x128xf32>
    %43 = tpu.matmul %42, %0, %cst_14 {dimension_numbers = #tpu.dot_dimension_numbers<[1], [0], [0], [1], [0, 0, 1, 1], [], []>} : vector<4x16xf32>, vector<16x128xf32>, vector<4x128xf32> -> vector<4x128xf32>
    %44 = vector.broadcast %2 : vector<1x128xf32> to vector<4x128xf32>
    %45 = arith.addf %43, %44 : vector<4x128xf32>
    %46 = arith.negf %10 : vector<4x128xf32>
    %47 = math.exp %46 : vector<4x128xf32>
    %cst_15 = arith.constant 1.000000e+00 : f32
    %48 = vector.broadcast %cst_15 : f32 to vector<4x128xf32>
    %49 = arith.addf %48, %47 : vector<4x128xf32>
    %50 = arith.divf %48, %49 : vector<4x128xf32>
    %51 = math.tanh %10 : vector<4x128xf32>
    %52 = vector.extract_strided_slice %50 {offsets = [0, 0], sizes = [4, 32], strides = [1, 1]} : vector<4x128xf32> to vector<4x32xf32>
    %53 = vector.extract_strided_slice %51 {offsets = [0, 64], sizes = [4, 32], strides = [1, 1]} : vector<4x128xf32> to vector<4x32xf32>
    %54 = arith.mulf %52, %53 : vector<4x32xf32>
    %55 = vector.extract_strided_slice %50 {offsets = [0, 96], sizes = [4, 32], strides = [1, 1]} : vector<4x128xf32> to vector<4x32xf32>
    %56 = math.tanh %54 : vector<4x32xf32>
    %57 = arith.mulf %55, %56 : vector<4x32xf32>
    %cst_16 = arith.constant dense<0.000000e+00> : vector<4x128xf32>
    %58 = tpu.matmul %57, %1, %cst_16 {dimension_numbers = #tpu.dot_dimension_numbers<[1], [0], [0], [1], [0, 0, 1, 1], [], []>} : vector<4x32xf32>, vector<32x128xf32>, vector<4x128xf32> -> vector<4x128xf32>
    %59 = arith.addf %15, %58 : vector<4x128xf32>
    %60 = arith.negf %59 : vector<4x128xf32>
    %61 = math.exp %60 : vector<4x128xf32>
    %cst_17 = arith.constant 1.000000e+00 : f32
    %62 = vector.broadcast %cst_17 : f32 to vector<4x128xf32>
    %63 = arith.addf %62, %61 : vector<4x128xf32>
    %64 = arith.divf %62, %63 : vector<4x128xf32>
    %65 = math.tanh %59 : vector<4x128xf32>
    %66 = vector.extract_strided_slice %64 {offsets = [0, 32], sizes = [4, 32], strides = [1, 1]} : vector<4x128xf32> to vector<4x32xf32>
    %67 = arith.mulf %66, %54 : vector<4x32xf32>
    %68 = vector.extract_strided_slice %64 {offsets = [0, 0], sizes = [4, 32], strides = [1, 1]} : vector<4x128xf32> to vector<4x32xf32>
    %69 = vector.extract_strided_slice %65 {offsets = [0, 64], sizes = [4, 32], strides = [1, 1]} : vector<4x128xf32> to vector<4x32xf32>
    %70 = arith.mulf %68, %69 : vector<4x32xf32>
    %71 = arith.addf %67, %70 : vector<4x32xf32>
    %72 = vector.extract_strided_slice %64 {offsets = [0, 96], sizes = [4, 32], strides = [1, 1]} : vector<4x128xf32> to vector<4x32xf32>
    %73 = math.tanh %71 : vector<4x32xf32>
    %74 = arith.mulf %72, %73 : vector<4x32xf32>
    %cst_18 = arith.constant dense<0.000000e+00> : vector<4x128xf32>
    %75 = tpu.matmul %74, %1, %cst_18 {dimension_numbers = #tpu.dot_dimension_numbers<[1], [0], [0], [1], [0, 0, 1, 1], [], []>} : vector<4x32xf32>, vector<32x128xf32>, vector<4x128xf32> -> vector<4x128xf32>
    %76 = arith.addf %20, %75 : vector<4x128xf32>
    %77 = arith.negf %76 : vector<4x128xf32>
    %78 = math.exp %77 : vector<4x128xf32>
    %cst_19 = arith.constant 1.000000e+00 : f32
    %79 = vector.broadcast %cst_19 : f32 to vector<4x128xf32>
    %80 = arith.addf %79, %78 : vector<4x128xf32>
    %81 = arith.divf %79, %80 : vector<4x128xf32>
    %82 = math.tanh %76 : vector<4x128xf32>
    %83 = vector.extract_strided_slice %81 {offsets = [0, 32], sizes = [4, 32], strides = [1, 1]} : vector<4x128xf32> to vector<4x32xf32>
    %84 = arith.mulf %83, %71 : vector<4x32xf32>
    %85 = vector.extract_strided_slice %81 {offsets = [0, 0], sizes = [4, 32], strides = [1, 1]} : vector<4x128xf32> to vector<4x32xf32>
    %86 = vector.extract_strided_slice %82 {offsets = [0, 64], sizes = [4, 32], strides = [1, 1]} : vector<4x128xf32> to vector<4x32xf32>
    %87 = arith.mulf %85, %86 : vector<4x32xf32>
    %88 = arith.addf %84, %87 : vector<4x32xf32>
    %89 = vector.extract_strided_slice %81 {offsets = [0, 96], sizes = [4, 32], strides = [1, 1]} : vector<4x128xf32> to vector<4x32xf32>
    %90 = math.tanh %88 : vector<4x32xf32>
    %91 = arith.mulf %89, %90 : vector<4x32xf32>
    %cst_20 = arith.constant dense<0.000000e+00> : vector<4x128xf32>
    %92 = tpu.matmul %91, %1, %cst_20 {dimension_numbers = #tpu.dot_dimension_numbers<[1], [0], [0], [1], [0, 0, 1, 1], [], []>} : vector<4x32xf32>, vector<32x128xf32>, vector<4x128xf32> -> vector<4x128xf32>
    %93 = arith.addf %25, %92 : vector<4x128xf32>
    %94 = arith.negf %93 : vector<4x128xf32>
    %95 = math.exp %94 : vector<4x128xf32>
    %cst_21 = arith.constant 1.000000e+00 : f32
    %96 = vector.broadcast %cst_21 : f32 to vector<4x128xf32>
    %97 = arith.addf %96, %95 : vector<4x128xf32>
    %98 = arith.divf %96, %97 : vector<4x128xf32>
    %99 = math.tanh %93 : vector<4x128xf32>
    %100 = vector.extract_strided_slice %98 {offsets = [0, 32], sizes = [4, 32], strides = [1, 1]} : vector<4x128xf32> to vector<4x32xf32>
    %101 = arith.mulf %100, %88 : vector<4x32xf32>
    %102 = vector.extract_strided_slice %98 {offsets = [0, 0], sizes = [4, 32], strides = [1, 1]} : vector<4x128xf32> to vector<4x32xf32>
    %103 = vector.extract_strided_slice %99 {offsets = [0, 64], sizes = [4, 32], strides = [1, 1]} : vector<4x128xf32> to vector<4x32xf32>
    %104 = arith.mulf %102, %103 : vector<4x32xf32>
    %105 = arith.addf %101, %104 : vector<4x32xf32>
    %106 = vector.extract_strided_slice %98 {offsets = [0, 96], sizes = [4, 32], strides = [1, 1]} : vector<4x128xf32> to vector<4x32xf32>
    %107 = math.tanh %105 : vector<4x32xf32>
    %108 = arith.mulf %106, %107 : vector<4x32xf32>
    %cst_22 = arith.constant dense<0.000000e+00> : vector<4x128xf32>
    %109 = tpu.matmul %108, %1, %cst_22 {dimension_numbers = #tpu.dot_dimension_numbers<[1], [0], [0], [1], [0, 0, 1, 1], [], []>} : vector<4x32xf32>, vector<32x128xf32>, vector<4x128xf32> -> vector<4x128xf32>
    %110 = arith.addf %30, %109 : vector<4x128xf32>
    %111 = arith.negf %110 : vector<4x128xf32>
    %112 = math.exp %111 : vector<4x128xf32>
    %cst_23 = arith.constant 1.000000e+00 : f32
    %113 = vector.broadcast %cst_23 : f32 to vector<4x128xf32>
    %114 = arith.addf %113, %112 : vector<4x128xf32>
    %115 = arith.divf %113, %114 : vector<4x128xf32>
    %116 = math.tanh %110 : vector<4x128xf32>
    %117 = vector.extract_strided_slice %115 {offsets = [0, 32], sizes = [4, 32], strides = [1, 1]} : vector<4x128xf32> to vector<4x32xf32>
    %118 = arith.mulf %117, %105 : vector<4x32xf32>
    %119 = vector.extract_strided_slice %115 {offsets = [0, 0], sizes = [4, 32], strides = [1, 1]} : vector<4x128xf32> to vector<4x32xf32>
    %120 = vector.extract_strided_slice %116 {offsets = [0, 64], sizes = [4, 32], strides = [1, 1]} : vector<4x128xf32> to vector<4x32xf32>
    %121 = arith.mulf %119, %120 : vector<4x32xf32>
    %122 = arith.addf %118, %121 : vector<4x32xf32>
    %123 = vector.extract_strided_slice %115 {offsets = [0, 96], sizes = [4, 32], strides = [1, 1]} : vector<4x128xf32> to vector<4x32xf32>
    %124 = math.tanh %122 : vector<4x32xf32>
    %125 = arith.mulf %123, %124 : vector<4x32xf32>
    %cst_24 = arith.constant dense<0.000000e+00> : vector<4x128xf32>
    %126 = tpu.matmul %125, %1, %cst_24 {dimension_numbers = #tpu.dot_dimension_numbers<[1], [0], [0], [1], [0, 0, 1, 1], [], []>} : vector<4x32xf32>, vector<32x128xf32>, vector<4x128xf32> -> vector<4x128xf32>
    %127 = arith.addf %35, %126 : vector<4x128xf32>
    %128 = arith.negf %127 : vector<4x128xf32>
    %129 = math.exp %128 : vector<4x128xf32>
    %cst_25 = arith.constant 1.000000e+00 : f32
    %130 = vector.broadcast %cst_25 : f32 to vector<4x128xf32>
    %131 = arith.addf %130, %129 : vector<4x128xf32>
    %132 = arith.divf %130, %131 : vector<4x128xf32>
    %133 = math.tanh %127 : vector<4x128xf32>
    %134 = vector.extract_strided_slice %132 {offsets = [0, 32], sizes = [4, 32], strides = [1, 1]} : vector<4x128xf32> to vector<4x32xf32>
    %135 = arith.mulf %134, %122 : vector<4x32xf32>
    %136 = vector.extract_strided_slice %132 {offsets = [0, 0], sizes = [4, 32], strides = [1, 1]} : vector<4x128xf32> to vector<4x32xf32>
    %137 = vector.extract_strided_slice %133 {offsets = [0, 64], sizes = [4, 32], strides = [1, 1]} : vector<4x128xf32> to vector<4x32xf32>
    %138 = arith.mulf %136, %137 : vector<4x32xf32>
    %139 = arith.addf %135, %138 : vector<4x32xf32>
    %140 = vector.extract_strided_slice %132 {offsets = [0, 96], sizes = [4, 32], strides = [1, 1]} : vector<4x128xf32> to vector<4x32xf32>
    %141 = math.tanh %139 : vector<4x32xf32>
    %142 = arith.mulf %140, %141 : vector<4x32xf32>
    %cst_26 = arith.constant dense<0.000000e+00> : vector<4x128xf32>
    %143 = tpu.matmul %142, %1, %cst_26 {dimension_numbers = #tpu.dot_dimension_numbers<[1], [0], [0], [1], [0, 0, 1, 1], [], []>} : vector<4x32xf32>, vector<32x128xf32>, vector<4x128xf32> -> vector<4x128xf32>
    %144 = arith.addf %40, %143 : vector<4x128xf32>
    %145 = arith.negf %144 : vector<4x128xf32>
    %146 = math.exp %145 : vector<4x128xf32>
    %cst_27 = arith.constant 1.000000e+00 : f32
    %147 = vector.broadcast %cst_27 : f32 to vector<4x128xf32>
    %148 = arith.addf %147, %146 : vector<4x128xf32>
    %149 = arith.divf %147, %148 : vector<4x128xf32>
    %150 = math.tanh %144 : vector<4x128xf32>
    %151 = vector.extract_strided_slice %149 {offsets = [0, 32], sizes = [4, 32], strides = [1, 1]} : vector<4x128xf32> to vector<4x32xf32>
    %152 = arith.mulf %151, %139 : vector<4x32xf32>
    %153 = vector.extract_strided_slice %149 {offsets = [0, 0], sizes = [4, 32], strides = [1, 1]} : vector<4x128xf32> to vector<4x32xf32>
    %154 = vector.extract_strided_slice %150 {offsets = [0, 64], sizes = [4, 32], strides = [1, 1]} : vector<4x128xf32> to vector<4x32xf32>
    %155 = arith.mulf %153, %154 : vector<4x32xf32>
    %156 = arith.addf %152, %155 : vector<4x32xf32>
    %157 = vector.extract_strided_slice %149 {offsets = [0, 96], sizes = [4, 32], strides = [1, 1]} : vector<4x128xf32> to vector<4x32xf32>
    %158 = math.tanh %156 : vector<4x32xf32>
    %159 = arith.mulf %157, %158 : vector<4x32xf32>
    %cst_28 = arith.constant dense<0.000000e+00> : vector<4x128xf32>
    %160 = tpu.matmul %159, %1, %cst_28 {dimension_numbers = #tpu.dot_dimension_numbers<[1], [0], [0], [1], [0, 0, 1, 1], [], []>} : vector<4x32xf32>, vector<32x128xf32>, vector<4x128xf32> -> vector<4x128xf32>
    %161 = arith.addf %45, %160 : vector<4x128xf32>
    %162 = arith.negf %161 : vector<4x128xf32>
    %163 = math.exp %162 : vector<4x128xf32>
    %cst_29 = arith.constant 1.000000e+00 : f32
    %164 = vector.broadcast %cst_29 : f32 to vector<4x128xf32>
    %165 = arith.addf %164, %163 : vector<4x128xf32>
    %166 = arith.divf %164, %165 : vector<4x128xf32>
    %167 = math.tanh %161 : vector<4x128xf32>
    %168 = vector.extract_strided_slice %166 {offsets = [0, 32], sizes = [4, 32], strides = [1, 1]} : vector<4x128xf32> to vector<4x32xf32>
    %169 = arith.mulf %168, %156 : vector<4x32xf32>
    %170 = vector.extract_strided_slice %166 {offsets = [0, 0], sizes = [4, 32], strides = [1, 1]} : vector<4x128xf32> to vector<4x32xf32>
    %171 = vector.extract_strided_slice %167 {offsets = [0, 64], sizes = [4, 32], strides = [1, 1]} : vector<4x128xf32> to vector<4x32xf32>
    %172 = arith.mulf %170, %171 : vector<4x32xf32>
    %173 = arith.addf %169, %172 : vector<4x32xf32>
    %174 = vector.extract_strided_slice %166 {offsets = [0, 96], sizes = [4, 32], strides = [1, 1]} : vector<4x128xf32> to vector<4x32xf32>
    %175 = math.tanh %173 : vector<4x32xf32>
    %176 = arith.mulf %174, %175 : vector<4x32xf32>
    %cst_30 = arith.constant dense<0.000000e+00> : vector<4x128xf32>
    %177 = tpu.matmul %176, %3, %cst_30 {dimension_numbers = #tpu.dot_dimension_numbers<[1], [0], [0], [1], [0, 0, 1, 1], [], []>} : vector<4x32xf32>, vector<32x128xf32>, vector<4x128xf32> -> vector<4x128xf32>
    %178 = vector.broadcast %4 : vector<1x128xf32> to vector<4x128xf32>
    %179 = arith.addf %177, %178 : vector<4x128xf32>
    %180 = vector.extract_strided_slice %179 {offsets = [0, 0], sizes = [4, 8], strides = [1, 1]} : vector<4x128xf32> to vector<4x8xf32>
    %c0_31 = arith.constant 0 : index
    %c0_32 = arith.constant 0 : index
    %181 = vector.load %arg2[%c0_31, %c0_32] : memref<4x8xf32, #tpu.memory_space<vmem>>, vector<4x8xf32>
    tpu.vector_store %arg2[%c0_31, %c0_32], %180 {strides = array<i32>} : memref<4x8xf32, #tpu.memory_space<vmem>>, vector<4x8xf32>,
    return
  }
}

</mosaic_0001>

<bundles_post_ra>
// kernel: forward.1
= control target key start
LH: loop header
LB: loop body
LE: loop exit
PB: predicated region body
PF: predicated region fallthrough
CT: control target
= control target key end

     0   :  { %7 = vsyncpa [#allocation3], 0  ;;  %s2204_s0 = inlined_call_operand.hbm [shape: f32[4,8,16], index: 0, kind: input, shape index: {}]   ;;  %s2205_s1 = inlined_call_operand.hbm [shape: f32[96,128], index: 1, kind: input, shape index: {}]   ;;  %s2206_s2 = inlined_call_operand.hbm [shape: f32[4,8], index: 2, kind: output, shape index: {}]  }
   0x1   :  { %8 = vsyncpa [#allocation6], 0 }
   0x2   :  { %9 = vsyncpa [#allocation4], 0  ;;  %s1890_s9 = smov [#allocation2]  }
   0x3   :  { %s15_s10 = sshll.u32 %s1890_s9, 4  ;;  %s16_s10 = int_to_ptr.vmem [resolvable:$true] %s15_s10 }
   0x4   :  { %s1832_s11 = scalar_lea.vmem %s16_s10, 512  ;;  %p1837_p1 = scmp.lt.s32.totalorder %s16_s10, %s16_s10 }
   0x5   :  { %p1833_p0 = scmp.ne.s32.totalorder %s16_s10, %s1832_s11  ;;  %p1838_p2 = scmp.lt.s32.totalorder %s1832_s11, %s1832_s11 }
   0x7   :  { %p1839_p3 = por %p1838_p2, %p1837_p1 }
   0x9   :  { %p1840_p4 = pnand %p1839_p3, %p1833_p0 }
   0xb   :  { %1843 = shalt.err (!%p1840_p4)
}
   0xc   :  { %s1891_s12 = smov 128   ;;  %s1892_s13 = smov 8  }
   0xd   :  { %21 = dma.hbm_to_vmem [thread:$0]  %s2204_s0, 512, %s16_s10, [#allocation3], %s1891_s12, %s1891_s12, %s1892_s13  }
   0xe   :  { %s1893_s16 = smov [#allocation5]  }
   0xf   :  { %s27_s17 = sshll.u32 %s1893_s16, 4  ;;  %s28_s17 = int_to_ptr.vmem [resolvable:$true] %s27_s17 }
  0x10   :  { %s1852_s18 = scalar_lea.vmem %s28_s17, 1536  ;;  %p1857_p6 = scmp.lt.s32.totalorder %s28_s17, %s28_s17 }
  0x11   :  { %p1853_p5 = scmp.ne.s32.totalorder %s28_s17, %s1852_s18  ;;  %p1858_p7 = scmp.lt.s32.totalorder %s1852_s18, %s1852_s18 }
  0x13   :  { %p1859_p8 = por %p1858_p7, %p1857_p6 }
  0x15   :  { %p1860_p9 = pnand %p1859_p8, %p1853_p5 }
  0x17   :  { %1863 = shalt.err (!%p1860_p9)
}
  0x18   :  { %33 = dma.hbm_to_vmem [thread:$0]  %s2205_s1, 1536, %s28_s17, [#allocation6], %s1891_s12, %s1891_s12, %s1892_s13  }
  0x19   :  { %1884 = dma.done.wait [#allocation3], 512  }
  0x1a   :  { %1885 = vsyncadd [#allocation3], 4294966784 }
  0x1b   :  { %1886 = dma.done.wait [#allocation6], 1536  }
  0x1c   :  { %1887 = vsyncadd [#allocation6], 4294965760  ;;  %v1894_v0 = vmov 0.0   ;;  %vm1895_vm0 = vmmov 0   ;;  %v1927_v1 = vld [vmem:[#allocation5 + $0x8] sm:$0xff]  ;;  %v1929_v2 = vld [vmem:[#allocation5] sm:$0xff] }
  0x1d   :  { %1606 = vmatprep.subr.mxu0 %v1894_v0  ;;  %1610 = vmatprep.mubr.msk.f32.mxu0 %vm1895_vm0, %v1894_v0  ;;  %v1931_v3 = vld [vmem:[#allocation2] sm:$0xff]  ;;  %v1934_v4 = vld [vmem:[#allocation2 + $0x8] sm:$0xff]  ;;  %v1936_v5 = vld [vmem:[#allocation2 + $0x10] sm:$0xff]  ;;  %vm65_vm1 = vcmask 1041409   ;;  %vm68_vm2 = vcmask 1042434   ;;  %vm71_vm3 = vcmask 1043459  }
  0x1e   :  { %1613 = vmatprep.subr.mxu1 %v1894_v0  ;;  %1617 = vmatprep.mubr.msk.f32.mxu1 %vm1895_vm0, %v1894_v0  ;;  %v1938_v6 = vld [vmem:[#allocation2 + $0x18] sm:$0xff]  ;;  %v64_v7 = vrot.slane %v1934_v4, 7  ;;  %v67_v8 = vrot.slane %v1936_v5, 6  ;;  %vm73_vm4 = vcmask 130048   ;;  %v1961_v13 = vld [vmem:[#allocation5 + $0x30] ss:$0 sm:$0xff] }
  0x1f   :  { %1607 = vmatpush3.msra.mxu0 %v1927_v1  ;;  %1614 = vmatpush3.msra.mxu1 %v1927_v1  ;;  %v70_v9 = vrot.slane %v1938_v6, 5  ;;  %s1896_s0 = smov 64   ;;  %v224_v24 = vrot.slane %v1931_v3, 2  ;;  %v225_v25 = vrot.slane %v1934_v4, 1  ;;  %v228_v26 = vrot.slane %v1938_v6, 7  ;;  %s1897_s1 = smov 96  }
  0x20   :  { %1608 = vmatprep.subr.mxu0 %v1894_v0  ;;  %1615 = vmatprep.subr.mxu1 %v1894_v0  ;;  %v66_v10 = vsel %vm65_vm1, %v64_v7, %v1931_v3  ;;  %v380_v27 = vrot.slane %v1931_v3, 4  ;;  %v381_v28 = vrot.slane %v1934_v4, 3  ;;  %v383_v29 = vrot.slane %v1936_v5, 2  ;;  %v2009_v51 = vld [vmem:[#allocation5 + $0x28] sm:$0xff]  ;;  %v2015_v52 = vld [vmem:[#allocation5 + $0x20] sm:$0xff]  ;;  %s1898_s21 = smov 32  }
  0x21   :  { %1609 = vmatpush3.msra.mxu0 %v1929_v2  ;;  %1616 = vmatpush3.msra.mxu1 %v1929_v2  ;;  %v69_v11 = vsel %vm68_vm2, %v67_v8, %v66_v10  ;;  %v538_v30 = vrot.slane %v1931_v3, 6  ;;  %v226_v31 = vsel %vm65_vm1, %v225_v25, %v224_v24  ;;  %v385_v32 = vrot.slane %v1938_v6, 1  ;;  %v2020_v53 = vld [vmem:[#allocation5 + $0x18] sm:$0xff]  ;;  %v2027_v54 = vld [vmem:[#allocation5 + $0x10] sm:$0xff]  ;;  %s1899_s22 = smov [#allocation7]  }
  0x22   :  { %1620 = vmatprep.subr.mxu0 %v1894_v0  ;;  %1627 = vmatprep.subr.mxu1 %v1894_v0  ;;  %v72_v12 = vsel %vm71_vm3, %v70_v9, %v69_v11  ;;  %v539_v33 = vrot.slane %v1934_v4, 5  ;;  %v541_v34 = vrot.slane %v1936_v5, 4  ;;  %v227_v35 = vsel %vm68_vm2, %v1936_v5, %v226_v31  ;;  %s1506_s23 = sshll.u32 %s1899_s22, 4  ;;  %s1507_s23 = int_to_ptr.vmem [resolvable:$true] %s1506_s23 }
  0x23   :  { %1611 = vmatmul.mubr.msk.f32.vlgmr.msra.gmra.mxu0 %vm73_vm4, %v72_v12  ;;  %v382_v36 = vsel %vm65_vm1, %v381_v28, %v380_v27  ;;  %v146_v37 = vrot.slane %v1931_v3, 1  ;;  %v148_v38 = vrot.slane %v1936_v5, 7  ;;  %v229_v39 = vsel %vm71_vm3, %v228_v26, %v227_v35  ;;  %s1864_s24 = scalar_lea.vmem %s1507_s23, 64  ;;  %p1869_p11 = scmp.lt.s32.totalorder %s1507_s23, %s1507_s23 }
  0x24   :  { %1621 = vmatpush3.msra.mxu0 %v1927_v1  ;;  %1624 = vmatprep.mubr.msk.f32.mxu0 %vm1895_vm0, %v1894_v0  ;;  %v384_v40 = vsel %vm68_vm2, %v383_v29, %v382_v36  ;;  %v540_v41 = vsel %vm65_vm1, %v539_v33, %v538_v30  ;;  %v150_v42 = vrot.slane %v1938_v6, 6  ;;  %v543_v45 = vrot.slane %v1938_v6, 3  ;;  %p1865_p10 = scmp.ne.s32.totalorder %s1507_s23, %s1864_s24  ;;  %p1870_p12 = scmp.lt.s32.totalorder %s1864_s24, %s1864_s24 }
  0x25   :  { %1622 = vmatprep.subr.mxu0 %v1894_v0  ;;  %v147_v43 = vsel %vm65_vm1, %v1934_v4, %v146_v37  ;;  %v386_v44 = vsel %vm71_vm3, %v385_v32, %v384_v40  ;;  %v542_v47 = vsel %vm68_vm2, %v541_v34, %v540_v41  ;;  %vm717_vm5 = vcmask 261120  }
  0x26   :  { %1623 = vmatpush3.msra.mxu0 %v1929_v2  ;;  %v149_v46 = vsel %vm68_vm2, %v148_v38, %v147_v43  ;;  %v544_v50 = vsel %vm71_vm3, %v543_v45, %v542_v47  ;;  %v302_v25 = vrot.slane %v1931_v3, 3  ;;  %v303_v26 = vrot.slane %v1934_v4, 2  ;;  %p1871_p13 = por %p1870_p12, %p1869_p11 }
  0x27   :  { %1634 = vmatprep.subr.mxu0 %v1894_v0  ;;  %1625 = vmatmul.mubr.msk.f32.vlgmr.msra.gmra.mxu0 %vm73_vm4, %v229_v39  ;;  %v151_v48 = vsel %vm71_vm3, %v150_v42, %v149_v46  ;;  %v305_v27 = vrot.slane %v1936_v5, 1  ;;  %v459_v28 = vrot.slane %v1931_v3, 5  ;;  %v460_v29 = vrot.slane %v1934_v4, 4 }
  0x28   :  { %1635 = vmatpush3.msra.mxu0 %v1927_v1  ;;  %1638 = vmatprep.mubr.msk.f32.mxu0 %vm1895_vm0, %v1894_v0  ;;  %v462_v30 = vrot.slane %v1936_v5, 3  ;;  %v617_v31 = vrot.slane %v1931_v3, 7  ;;  %v304_v32 = vsel %vm65_vm1, %v303_v26, %v302_v25  ;;  %v464_v33 = vrot.slane %v1938_v6, 2  ;;  %p1872_p0 = pnand %p1871_p13, %p1865_p10 }
  0x29   :  { %1636 = vmatprep.subr.mxu0 %v1894_v0  ;;  %1618 = vmatmul.mubr.msk.f32.vlgmr.msra.gmra.mxu1 %vm73_vm4, %v151_v48  ;;  %v618_v34 = vrot.slane %v1934_v4, 6  ;;  %v306_v35 = vsel %vm68_vm2, %v305_v27, %v304_v32  ;;  %v461_v36 = vsel %vm65_vm1, %v460_v29, %v459_v28  ;;  %v620_v37 = vrot.slane %v1936_v5, 5 }
  0x2a   :  { %1637 = vmatpush3.msra.mxu0 %v1929_v2  ;;  %1628 = vmatpush3.msra.mxu1 %v1927_v1  ;;  %v307_v38 = vsel %vm71_vm3, %v1938_v6, %v306_v35  ;;  %v463_v39 = vsel %vm68_vm2, %v462_v30, %v461_v36  ;;  %v622_v4 = vrot.slane %v1938_v6, 4  ;;  %vm1498_vm6 = vcmask 60416  }
  0x2b   :  { %1639 = vmatmul.mubr.msk.f32.vlgmr.msra.gmra.mxu0 %vm73_vm4, %v386_v44  ;;  %1648 = vmatprep.subr.mxu0 %v1894_v0  ;;  %v619_v40 = vsel %vm65_vm1, %v618_v34, %v617_v31  ;;  %v465_v3 = vsel %vm71_vm3, %v464_v33, %v463_v39 }
  0x2c   :  { %1649 = vmatpush3.msra.mxu0 %v1927_v1  ;;  %1652 = vmatprep.mubr.msk.f32.mxu0 %vm1895_vm0, %v1894_v0  ;;  %v621_v5 = vsel %vm68_vm2, %v620_v37, %v619_v40 }
  0x2d   :  { %1650 = vmatprep.subr.mxu0 %v1894_v0  ;;  %1629 = vmatprep.subr.mxu1 %v1894_v0  ;;  %v623_v42 = vsel %vm71_vm3, %v622_v4, %v621_v5 }
  0x2e   :  { %1651 = vmatpush3.msra.mxu0 %v1929_v2  ;;  %1630 = vmatpush3.msra.mxu1 %v1929_v2 }
  0x2f   :  { %1653 = vmatmul.mubr.msk.f32.vlgmr.msra.gmra.mxu0 %vm73_vm4, %v544_v50  ;;  %1662 = vmatprep.subr.mxu0 %v1894_v0 }
  0x30   :  { %1663 = vmatpush3.msra.mxu0 %v2009_v51  ;;  %1670 = vmatprep.mubr.msk.f32.mxu0 %vm1895_vm0, %v1894_v0 }
  0x31   :  { %1664 = vmatprep.subr.mxu0 %v1894_v0  ;;  %1631 = vmatprep.mubr.msk.f32.mxu1 %vm1895_vm0, %v1894_v0 }
  0x32   :  { %1665 = vmatpush3.msra.mxu0 %v2015_v52  ;;  %1641 = vmatprep.subr.mxu1 %v1894_v0 }
  0x33   :  { %1666 = vmatprep.subr.mxu0 %v1894_v0  ;;  %1632 = vmatmul.mubr.msk.f32.vlgmr.msra.gmra.mxu1 %vm73_vm4, %v307_v38 }
  0x34   :  { %1667 = vmatpush3.msra.mxu0 %v2020_v53  ;;  %1642 = vmatpush3.msra.mxu1 %v1927_v1 }
  0x35   :  { %1668 = vmatprep.subr.mxu0 %v1894_v0  ;;  %1645 = vmatprep.mubr.msk.f32.mxu1 %vm1895_vm0, %v1894_v0 }
  0x36   :  { %1669 = vmatpush3.msra.mxu0 %v2027_v54  ;;  %1643 = vmatprep.subr.mxu1 %v1894_v0 }
  0x37   :  { %1684 = vmatprep.subr.mxu0 %v1894_v0  ;;  %1644 = vmatpush3.msra.mxu1 %v1929_v2 }
  0x38   :  { %1646 = vmatmul.mubr.msk.f32.vlgmr.msra.gmra.mxu1 %vm73_vm4, %v465_v3  ;;  %1655 = vmatprep.subr.mxu1 %v1894_v0 }
  0x39   :  { %1656 = vmatpush3.msra.mxu1 %v1927_v1  ;;  %1659 = vmatprep.mubr.msk.f32.mxu1 %vm1895_vm0, %v1894_v0 }
  0x3a   :  { %1657 = vmatprep.subr.mxu1 %v1894_v0 }
  0x3b   :  { %1658 = vmatpush3.msra.mxu1 %v1929_v2 }
  0x3c   :  { %1660 = vmatmul.mubr.msk.f32.vlgmr.msra.gmra.mxu1 %vm73_vm4, %v623_v42  ;;  %1673 = vmatprep.subr.mxu1 %v1894_v0 }
  0x3d   :  { %1674 = vmatpush3.msra.mxu1 %v2009_v51  ;;  %1681 = vmatprep.mubr.msk.f32.mxu1 %vm1895_vm0, %v1894_v0 }
  0x3e   :  { %1675 = vmatprep.subr.mxu1 %v1894_v0 }
  0x3f   :  { %1676 = vmatpush3.msra.mxu1 %v2015_v52 }
  0x40   :  { %1677 = vmatprep.subr.mxu1 %v1894_v0 }
  0x41   :  { %1678 = vmatpush3.msra.mxu1 %v2020_v53 }
  0x42   :  { %1679 = vmatprep.subr.mxu1 %v1894_v0 }
  0x43   :  { %1680 = vmatpush3.msra.mxu1 %v2027_v54 }
  0x44   :  { %1695 = vmatprep.subr.mxu1 %v1894_v0 }
  0xe3   :  { %v142_v14 = vpop.f32.mrf.mxu0 }
  0xe4   :  { %v143_v15 = vadd.f32 %v1961_v13, %v142_v14 }
  0xe5   :  { %v1612_v16 = vpop.f32.mrf.mxu0 }
  0xe6   :  { %1760 = vtanh.f32 %v143_v15  ;;  %v1525_v18 = vmul.f32 -1.442695, %v143_v15 }
  0xe7   :  { %v2039_v57 = vpop.f32.mrf.mxu0 }
  0xe8   :  { %1762 = vpow2.f32 %v1525_v18 }
  0xe9   :  { %v1626_v58 = vpop.f32.mrf.mxu0  ;;  %v220_v59 = vpop.f32.mrf.mxu1 }
  0xea   :  { %v221_v9 = vadd.f32 %v1961_v13, %v220_v59 }
  0xeb   :  { %v2041_v60 = vpop.f32.mrf.mxu0  ;;  %v1619_v61 = vpop.f32.mrf.mxu1 }
  0xec   :  { %v456_v35 = vadd.f32 %v1961_v13, %v2041_v60 }
  0xed   :  { %v1640_v62 = vpop.f32.mrf.mxu0 }
  0xef   :  { %v2043_v63 = vpop.f32.mrf.mxu0 }
  0xf1   :  { %v1654_v7 = vpop.f32.mrf.mxu0 }
  0xf3   :  { %v1761_v17 = vpop.eup %1760  ;;  %v376_v6 = vpop.f32.mrf.mxu1 }
  0xf4   :  { %704 = vrot.lane.b32.xlu0 %v1761_v17, %s1896_s0 }
  0xf5   :  { %v1763_v19 = vpop.eup %1762  ;;  %v1633_v43 = vpop.f32.mrf.mxu1 }
  0xf6   :  { %v699_v20 = vadd.f32 1.0, %v1763_v19 }
  0xf8   :  { %1764 = vrcp.f32 %v699_v20  ;;  %v2110_v44 = vpop.f32.mrf.mxu1 }
  0xfa   :  { %v1647_v45 = vpop.f32.mrf.mxu1 }
  0xfc   :  { %v2112_v46 = vpop.f32.mrf.mxu1 }
  0xfe   :  { %v1661_v47 = vpop.f32.mrf.mxu1 }
 0x105   :  { %v1965_v21 = vpop.eup %1764 }
 0x166   :  { %v705_v22 = vpop.permute.xlu0 %704 }
 0x167   :  { %v707_v23 = vmul.f32 %v1965_v21, %v705_v22 }
 0x169   :  { %1766 = vtanh.f32 %v707_v23 }
 0x176   :  { %v1767_v49 = vpop.eup %1766 }
 0x177   :  { %710 = vrot.lane.b32.xlu0 %v1767_v49, %s1897_s1  ;;  %v299_v49 = vadd.f32 %v1961_v13, %v2039_v57 }
 0x17b   :  { %799 = vrot.lane.b32.xlu0 %v707_v23, %s1898_s21 }
 0x1e9   :  { %v711_v55 = vpop.permute.xlu0 %710 }
 0x1ea   :  { %v713_v56 = vmul.f32 %v1965_v21, %v711_v55 }
 0x1ec   :  { %715 = vrot.lane.b32.xlu1 %v713_v56, %s1898_s21 }
 0x1ed   :  { %v800_v21 = vpop.permute.xlu0 %799 }
 0x25e   :  { %v716_v8 = vpop.permute.xlu1 %715 }
 0x25f   :  { %1671 = vmatmul.mubr.msk.f32.vlgmr.msra.gmra.mxu0 %vm717_vm5, %v716_v8 }
 0x260   :  { %1685 = vmatpush3.msra.mxu0 %v2009_v51  ;;  %1692 = vmatprep.mubr.msk.f32.mxu0 %vm1895_vm0, %v1894_v0 }
 0x261   :  { %1686 = vmatprep.subr.mxu0 %v1894_v0 }
 0x262   :  { %1687 = vmatpush3.msra.mxu0 %v2015_v52 }
 0x263   :  { %1688 = vmatprep.subr.mxu0 %v1894_v0 }
 0x264   :  { %1689 = vmatpush3.msra.mxu0 %v2020_v53 }
 0x265   :  { %1690 = vmatprep.subr.mxu0 %v1894_v0 }
 0x266   :  { %1691 = vmatpush3.msra.mxu0 %v2027_v54 }
 0x267   :  { %1706 = vmatprep.subr.mxu0 %v1894_v0 }
 0x31f   :  { %v786_v10 = vpop.f32.mrf.mxu0 }
 0x320   :  { %v790_v11 = vadd.f32 %v786_v10, %v221_v9 }
 0x321   :  { %v1672_v12 = vpop.f32.mrf.mxu0 }
 0x322   :  { %1768 = vtanh.f32 %v790_v11  ;;  %v1527_v15 = vmul.f32 -1.442695, %v790_v11 }
 0x324   :  { %1770 = vpow2.f32 %v1527_v15 }
 0x32f   :  { %v1769_v14 = vpop.eup %1768 }
 0x330   :  { %804 = vrot.lane.b32.xlu1 %v1769_v14, %s1896_s0 }
 0x331   :  { %v1771_v16 = vpop.eup %1770 }
 0x332   :  { %v794_v17 = vadd.f32 1.0, %v1771_v16 }
 0x334   :  { %1772 = vrcp.f32 %v794_v17  ;;  %v377_v17 = vadd.f32 %v1961_v13, %v376_v6 }
 0x341   :  { %v1773_v18 = vpop.eup %1772 }
 0x342   :  { %v802_v22 = vmul.f32 %v1773_v18, %v800_v21 }
 0x3a2   :  { %v805_v19 = vpop.permute.xlu1 %804 }
 0x3a3   :  { %v807_v20 = vmul.f32 %v1773_v18, %v805_v19 }
 0x3a5   :  { %809 = vrot.lane.b32.xlu1 %v807_v20, %s1898_s21 }
 0x417   :  { %v810_v23 = vpop.permute.xlu1 %809 }
 0x418   :  { %v2059_v24 = vadd.f32 %v810_v23, %v802_v22 }
 0x41a   :  { %1774 = vtanh.f32 %v2059_v24 }
 0x427   :  { %v1775_v41 = vpop.eup %1774 }
 0x428   :  { %815 = vrot.lane.b32.xlu0 %v1775_v41, %s1896_s0 }
 0x49a   :  { %v816_v1 = vpop.permute.xlu0 %815 }
 0x49b   :  { %v818_v2 = vmul.f32 %v1773_v18, %v816_v1 }
 0x49d   :  { %820 = vrot.lane.b32.xlu1 %v818_v2, %s1898_s21 }
 0x50f   :  { %v821_v48 = vpop.permute.xlu1 %820 }
 0x510   :  { %1682 = vmatmul.mubr.msk.f32.vlgmr.msra.gmra.mxu1 %vm717_vm5, %v821_v48  ;;  %v535_v48 = vadd.f32 %v1961_v13, %v2110_v44 }
 0x511   :  { %1696 = vmatpush3.msra.mxu1 %v2009_v51  ;;  %1703 = vmatprep.mubr.msk.f32.mxu1 %vm1895_vm0, %v1894_v0 }
 0x512   :  { %1697 = vmatprep.subr.mxu1 %v1894_v0 }
 0x513   :  { %1698 = vmatpush3.msra.mxu1 %v2015_v52 }
 0x514   :  { %1699 = vmatprep.subr.mxu1 %v1894_v0 }
 0x515   :  { %1700 = vmatpush3.msra.mxu1 %v2020_v53 }
 0x516   :  { %1701 = vmatprep.subr.mxu1 %v1894_v0 }
 0x517   :  { %1702 = vmatpush3.msra.mxu1 %v2027_v54 }
 0x518   :  { %1717 = vmatprep.subr.mxu1 %v1894_v0 }
 0x5d0   :  { %v890_v50 = vpop.f32.mrf.mxu1 }
 0x5d1   :  { %v894_v55 = vadd.f32 %v890_v50, %v299_v49 }
 0x5d2   :  { %v1683_v56 = vpop.f32.mrf.mxu1 }
 0x5d3   :  { %1776 = vtanh.f32 %v894_v55  ;;  %v1529_v59 = vmul.f32 -1.442695, %v894_v55 }
 0x5d5   :  { %1778 = vpow2.f32 %v1529_v59 }
 0x5e0   :  { %v1777_v58 = vpop.eup %1776 }
 0x5e1   :  { %904 = vrot.lane.b32.xlu0 %v1777_v58, %s1896_s0 }
 0x5e2   :  { %v1779_v61 = vpop.eup %1778 }
 0x5e3   :  { %v898_v62 = vadd.f32 1.0, %v1779_v61 }
 0x5e5   :  { %1780 = vrcp.f32 %v898_v62 }
 0x5f2   :  { %v1781_v7 = vpop.eup %1780 }
 0x5f3   :  { %v902_v10 = vmul.f32 %v1781_v7, %v2059_v24 }
 0x653   :  { %v905_v8 = vpop.permute.xlu0 %904 }
 0x654   :  { %v907_v9 = vmul.f32 %v1781_v7, %v905_v8 }
 0x656   :  { %909 = vrot.lane.b32.xlu1 %v907_v9, %s1898_s21 }
 0x6c8   :  { %v910_v57 = vpop.permute.xlu1 %909 }
 0x6c9   :  { %v912_v11 = vadd.f32 %v910_v57, %v902_v10  ;;  %v614_v57 = vadd.f32 %v1961_v13, %v2043_v63 }
 0x6cb   :  { %1782 = vtanh.f32 %v912_v11 }
 0x6d8   :  { %v1783_v12 = vpop.eup %1782 }
 0x6d9   :  { %915 = vrot.lane.b32.xlu0 %v1783_v12, %s1896_s0 }
 0x74b   :  { %v916_v14 = vpop.permute.xlu0 %915 }
 0x74c   :  { %v918_v15 = vmul.f32 %v1781_v7, %v916_v14 }
 0x74e   :  { %920 = vrot.lane.b32.xlu1 %v918_v15, %s1898_s21 }
 0x7c0   :  { %v921_v16 = vpop.permute.xlu1 %920 }
 0x7c1   :  { %1693 = vmatmul.mubr.msk.f32.vlgmr.msra.gmra.mxu0 %vm717_vm5, %v921_v16 }
 0x7c2   :  { %1707 = vmatpush3.msra.mxu0 %v2009_v51  ;;  %1714 = vmatprep.mubr.msk.f32.mxu0 %vm1895_vm0, %v1894_v0 }
 0x7c3   :  { %1708 = vmatprep.subr.mxu0 %v1894_v0 }
 0x7c4   :  { %1709 = vmatpush3.msra.mxu0 %v2015_v52 }
 0x7c5   :  { %1710 = vmatprep.subr.mxu0 %v1894_v0 }
 0x7c6   :  { %1711 = vmatpush3.msra.mxu0 %v2020_v53 }
 0x7c7   :  { %1712 = vmatprep.subr.mxu0 %v1894_v0 }
 0x7c8   :  { %1713 = vmatpush3.msra.mxu0 %v2027_v54 }
 0x7c9   :  { %1728 = vmatprep.subr.mxu0 %v1894_v0 }
 0x881   :  { %v990_v18 = vpop.f32.mrf.mxu0 }
 0x882   :  { %v994_v19 = vadd.f32 %v990_v18, %v377_v17 }
 0x883   :  { %v1694_v20 = vpop.f32.mrf.mxu0 }
 0x884   :  { %1784 = vtanh.f32 %v994_v19  ;;  %v1531_v22 = vmul.f32 -1.442695, %v994_v19 }
 0x886   :  { %1786 = vpow2.f32 %v1531_v22 }
 0x891   :  { %v1785_v21 = vpop.eup %1784 }
 0x892   :  { %1004 = vrot.lane.b32.xlu0 %v1785_v21, %s1896_s0 }
 0x893   :  { %v1787_v23 = vpop.eup %1786 }
 0x894   :  { %v998_v24 = vadd.f32 1.0, %v1787_v23 }
 0x896   :  { %1788 = vrcp.f32 %v998_v24 }
 0x8a3   :  { %v1789_v25 = vpop.eup %1788 }
 0x8a4   :  { %v1002_v28 = vmul.f32 %v1789_v25, %v912_v11 }
 0x904   :  { %v1005_v26 = vpop.permute.xlu0 %1004 }
 0x905   :  { %v1007_v27 = vmul.f32 %v1789_v25, %v1005_v26 }
 0x907   :  { %1009 = vrot.lane.b32.xlu1 %v1007_v27, %s1898_s21 }
 0x979   :  { %v1010_v29 = vpop.permute.xlu1 %1009 }
 0x97a   :  { %v1012_v30 = vadd.f32 %v1010_v29, %v1002_v28  ;;  %v693_v28 = vadd.f32 %v1961_v13, %v2112_v46  ;;  %v50_v46 = vld [vmem:[#allocation5 + $0x50] sm:$0xff] }
 0x97c   :  { %1790 = vtanh.f32 %v1012_v30 }
 0x989   :  { %v1791_v31 = vpop.eup %1790 }
 0x98a   :  { %1015 = vrot.lane.b32.xlu0 %v1791_v31, %s1896_s0 }
 0x9fc   :  { %v1016_v32 = vpop.permute.xlu0 %1015 }
 0x9fd   :  { %v1018_v33 = vmul.f32 %v1789_v25, %v1016_v32 }
 0x9ff   :  { %1020 = vrot.lane.b32.xlu1 %v1018_v33, %s1898_s21 }
 0xa71   :  { %v1021_v34 = vpop.permute.xlu1 %1020 }
 0xa72   :  { %1704 = vmatmul.mubr.msk.f32.vlgmr.msra.gmra.mxu1 %vm717_vm5, %v1021_v34 }
 0xa73   :  { %1718 = vmatpush3.msra.mxu1 %v2009_v51  ;;  %1725 = vmatprep.mubr.msk.f32.mxu1 %vm1895_vm0, %v1894_v0 }
 0xa74   :  { %1719 = vmatprep.subr.mxu1 %v1894_v0 }
 0xa75   :  { %1720 = vmatpush3.msra.mxu1 %v2015_v52 }
 0xa76   :  { %1721 = vmatprep.subr.mxu1 %v1894_v0 }
 0xa77   :  { %1722 = vmatpush3.msra.mxu1 %v2020_v53 }
 0xa78   :  { %1723 = vmatprep.subr.mxu1 %v1894_v0 }
 0xa79   :  { %1724 = vmatpush3.msra.mxu1 %v2027_v54 }
 0xa7a   :  { %1739 = vmatprep.subr.mxu1 %v1894_v0 }
 0xb32   :  { %v1090_v36 = vpop.f32.mrf.mxu1 }
 0xb33   :  { %v1094_v37 = vadd.f32 %v1090_v36, %v456_v35 }
 0xb34   :  { %v1705_v38 = vpop.f32.mrf.mxu1 }
 0xb35   :  { %1792 = vtanh.f32 %v1094_v37  ;;  %v1533_v40 = vmul.f32 -1.442695, %v1094_v37 }
 0xb37   :  { %1794 = vpow2.f32 %v1533_v40 }
 0xb42   :  { %v1793_v39 = vpop.eup %1792 }
 0xb43   :  { %1104 = vrot.lane.b32.xlu0 %v1793_v39, %s1896_s0 }
 0xb44   :  { %v1795_v3 = vpop.eup %1794 }
 0xb45   :  { %v1098_v4 = vadd.f32 1.0, %v1795_v3  ;;  %v49_v3 = vld [vmem:[#allocation5 + $0x48] sm:$0xff] }
 0xb47   :  { %1796 = vrcp.f32 %v1098_v4  ;;  %v48_v4 = vld [vmem:[#allocation5 + $0x40] sm:$0xff] }
 0xb54   :  { %v1797_v5 = vpop.eup %1796 }
 0xb55   :  { %v1102_v1 = vmul.f32 %v1797_v5, %v1012_v30 }
 0xbb5   :  { %v1105_v41 = vpop.permute.xlu0 %1104 }
 0xbb6   :  { %v1107_v42 = vmul.f32 %v1797_v5, %v1105_v41 }
 0xbb8   :  { %1109 = vrot.lane.b32.xlu1 %v1107_v42, %s1898_s21 }
 0xc2a   :  { %v1110_v2 = vpop.permute.xlu1 %1109 }
 0xc2b   :  { %v1112_v60 = vadd.f32 %v1110_v2, %v1102_v1 }
 0xc2d   :  { %1798 = vtanh.f32 %v1112_v60 }
 0xc3a   :  { %v1799_v6 = vpop.eup %1798 }
 0xc3b   :  { %1115 = vrot.lane.b32.xlu0 %v1799_v6, %s1896_s0 }
 0xcad   :  { %v1116_v43 = vpop.permute.xlu0 %1115 }
 0xcae   :  { %v1118_v45 = vmul.f32 %v1797_v5, %v1116_v43  ;;  %v47_v5 = vld [vmem:[#allocation5 + $0x38] sm:$0xff] }
 0xcb0   :  { %1120 = vrot.lane.b32.xlu1 %v1118_v45, %s1898_s21 }
 0xd22   :  { %v1121_v47 = vpop.permute.xlu1 %1120 }
 0xd23   :  { %1715 = vmatmul.mubr.msk.f32.vlgmr.msra.gmra.mxu0 %vm717_vm5, %v1121_v47 }
 0xd24   :  { %1729 = vmatpush3.msra.mxu0 %v2009_v51  ;;  %1736 = vmatprep.mubr.msk.f32.mxu0 %vm1895_vm0, %v1894_v0 }
 0xd25   :  { %1730 = vmatprep.subr.mxu0 %v1894_v0 }
 0xd26   :  { %1731 = vmatpush3.msra.mxu0 %v2015_v52 }
 0xd27   :  { %1732 = vmatprep.subr.mxu0 %v1894_v0 }
 0xd28   :  { %1733 = vmatpush3.msra.mxu0 %v2020_v53 }
 0xd29   :  { %1734 = vmatprep.subr.mxu0 %v1894_v0 }
 0xd2a   :  { %1735 = vmatpush3.msra.mxu0 %v2027_v54 }
 0xde3   :  { %v1190_v49 = vpop.f32.mrf.mxu0 }
 0xde4   :  { %v1194_v51 = vadd.f32 %v1190_v49, %v535_v48 }
 0xde5   :  { %v1716_v50 = vpop.f32.mrf.mxu0 }
 0xde6   :  { %1800 = vtanh.f32 %v1194_v51  ;;  %v1535_v56 = vmul.f32 -1.442695, %v1194_v51 }
 0xde8   :  { %1802 = vpow2.f32 %v1535_v56 }
 0xdf3   :  { %v1801_v55 = vpop.eup %1800 }
 0xdf4   :  { %1204 = vrot.lane.b32.xlu0 %v1801_v55, %s1896_s0 }
 0xdf5   :  { %v1803_v52 = vpop.eup %1802 }
 0xdf6   :  { %v1198_v58 = vadd.f32 1.0, %v1803_v52 }
 0xdf8   :  { %1804 = vrcp.f32 %v1198_v58 }
 0xe05   :  { %v1805_v53 = vpop.eup %1804 }
 0xe06   :  { %v1202_v54 = vmul.f32 %v1805_v53, %v1112_v60  ;;  %v1540_v60 = vld [vmem:[#allocation5 + $0x58] ss:$0 sm:$0xff] }
 0xe66   :  { %v1205_v59 = vpop.permute.xlu0 %1204 }
 0xe67   :  { %v1207_v61 = vmul.f32 %v1805_v53, %v1205_v59 }
 0xe69   :  { %1209 = vrot.lane.b32.xlu1 %v1207_v61, %s1898_s21 }
 0xedb   :  { %v1210_v62 = vpop.permute.xlu1 %1209 }
 0xedc   :  { %v1212_v44 = vadd.f32 %v1210_v62, %v1202_v54 }
 0xede   :  { %1806 = vtanh.f32 %v1212_v44 }
 0xeeb   :  { %v1807_v7 = vpop.eup %1806 }
 0xeec   :  { %1215 = vrot.lane.b32.xlu0 %v1807_v7, %s1896_s0 }
 0xf5e   :  { %v1216_v8 = vpop.permute.xlu0 %1215 }
 0xf5f   :  { %v1218_v9 = vmul.f32 %v1805_v53, %v1216_v8 }
 0xf61   :  { %1220 = vrot.lane.b32.xlu1 %v1218_v9, %s1898_s21 }
 0xfd3   :  { %v1221_v10 = vpop.permute.xlu1 %1220 }
 0xfd4   :  { %1726 = vmatmul.mubr.msk.f32.vlgmr.msra.gmra.mxu1 %vm717_vm5, %v1221_v10 }
 0xfd5   :  { %1747 = vmatprep.mubr.msk.f32.mxu1 %vm1895_vm0, %v1894_v0  ;;  %1740 = vmatpush3.msra.mxu1 %v50_v46 }
 0xfd6   :  { %1741 = vmatprep.subr.mxu1 %v1894_v0 }
 0xfd7   :  { %1742 = vmatpush3.msra.mxu1 %v49_v3 }
 0xfd8   :  { %1743 = vmatprep.subr.mxu1 %v1894_v0 }
 0xfd9   :  { %1744 = vmatpush3.msra.mxu1 %v48_v4 }
 0xfda   :  { %1745 = vmatprep.subr.mxu1 %v1894_v0 }
 0xfdb   :  { %1746 = vmatpush3.msra.mxu1 %v47_v5 }
0x1094   :  { %v1290_v11 = vpop.f32.mrf.mxu1 }
0x1095   :  { %v1294_v12 = vadd.f32 %v1290_v11, %v614_v57 }
0x1096   :  { %v1727_v14 = vpop.f32.mrf.mxu1 }
0x1097   :  { %1808 = vtanh.f32 %v1294_v12  ;;  %v1537_v16 = vmul.f32 -1.442695, %v1294_v12 }
0x1099   :  { %1810 = vpow2.f32 %v1537_v16 }
0x10a4   :  { %v1809_v15 = vpop.eup %1808 }
0x10a5   :  { %1304 = vrot.lane.b32.xlu0 %v1809_v15, %s1896_s0 }
0x10a6   :  { %v1811_v17 = vpop.eup %1810 }
0x10a7   :  { %v1298_v18 = vadd.f32 1.0, %v1811_v17 }
0x10a9   :  { %1812 = vrcp.f32 %v1298_v18 }
0x10b6   :  { %v1813_v19 = vpop.eup %1812 }
0x10b7   :  { %v1302_v22 = vmul.f32 %v1813_v19, %v1212_v44 }
0x1117   :  { %v1305_v20 = vpop.permute.xlu0 %1304 }
0x1118   :  { %v1307_v21 = vmul.f32 %v1813_v19, %v1305_v20 }
0x111a   :  { %1309 = vrot.lane.b32.xlu1 %v1307_v21, %s1898_s21 }
0x118c   :  { %v1310_v23 = vpop.permute.xlu1 %1309 }
0x118d   :  { %v1312_v63 = vadd.f32 %v1310_v23, %v1302_v22 }
0x118f   :  { %1814 = vtanh.f32 %v1312_v63 }
0x119c   :  { %v1815_v24 = vpop.eup %1814 }
0x119d   :  { %1315 = vrot.lane.b32.xlu0 %v1815_v24, %s1896_s0 }
0x120f   :  { %v1316_v25 = vpop.permute.xlu0 %1315 }
0x1210   :  { %v1318_v26 = vmul.f32 %v1813_v19, %v1316_v25 }
0x1212   :  { %1320 = vrot.lane.b32.xlu1 %v1318_v26, %s1898_s21 }
0x1284   :  { %v1321_v27 = vpop.permute.xlu1 %1320 }
0x1285   :  { %1737 = vmatmul.mubr.msk.f32.vlgmr.msra.gmra.mxu0 %vm717_vm5, %v1321_v27 }
0x1345   :  { %v1390_v29 = vpop.f32.mrf.mxu0 }
0x1346   :  { %v1394_v30 = vadd.f32 %v1390_v29, %v693_v28 }
0x1347   :  { %v1738_v31 = vpop.f32.mrf.mxu0 }
0x1348   :  { %1816 = vtanh.f32 %v1394_v30  ;;  %v1539_v33 = vmul.f32 -1.442695, %v1394_v30 }
0x134a   :  { %1818 = vpow2.f32 %v1539_v33 }
0x1355   :  { %v1817_v32 = vpop.eup %1816 }
0x1356   :  { %1404 = vrot.lane.b32.xlu0 %v1817_v32, %s1896_s0 }
0x1357   :  { %v1819_v34 = vpop.eup %1818 }
0x1358   :  { %v1398_v35 = vadd.f32 1.0, %v1819_v34 }
0x135a   :  { %1820 = vrcp.f32 %v1398_v35 }
0x1367   :  { %v1821_v36 = vpop.eup %1820 }
0x1368   :  { %v1402_v39 = vmul.f32 %v1821_v36, %v1312_v63 }
0x13c8   :  { %v1405_v37 = vpop.permute.xlu0 %1404 }
0x13c9   :  { %v1407_v38 = vmul.f32 %v1821_v36, %v1405_v37 }
0x13cb   :  { %1409 = vrot.lane.b32.xlu1 %v1407_v38, %s1898_s21 }
0x143d   :  { %v1410_v40 = vpop.permute.xlu1 %1409 }
0x143e   :  { %v1412_v13 = vadd.f32 %v1410_v40, %v1402_v39 }
0x1440   :  { %1822 = vtanh.f32 %v1412_v13 }
0x144d   :  { %v1823_v41 = vpop.eup %1822 }
0x144e   :  { %1415 = vrot.lane.b32.xlu0 %v1823_v41, %s1896_s0 }
0x14c0   :  { %v1416_v42 = vpop.permute.xlu0 %1415 }
0x14c1   :  { %v1418_v1 = vmul.f32 %v1821_v36, %v1416_v42 }
0x14c3   :  { %1424 = vrot.lane.b32.xlu1 %v1418_v1, %s1898_s21 }
0x1535   :  { %v1425_v2 = vpop.permute.xlu1 %1424 }
0x1536   :  { %1748 = vmatmul.mubr.msk.f32.vlgmr.msra.gmra.mxu1 %vm717_vm5, %v1425_v2 }
0x15f6   :  { %v1494_v6 = vpop.f32.mrf.mxu1 }
0x15f7   :  { %v1495_v43 = vadd.f32 %v1540_v60, %v1494_v6 }
0x15f8   :  { %v1749_v45 = vpop.f32.mrf.mxu1 }
0x15f9   :  { %1499 = vst.msk [vmem:[#allocation7] sm:$0xf] %vm1498_vm6, %v1495_v43 }
0x15fa   :  { %1875 = shalt.err (!%p1872_p0)
}
0x15fb   :  { %1509 = dma.vmem_to_hbm [thread:$0]  %s1507_s23, 64, %s2206_s2, [#allocation4]  }
0x15fc   :  { %1888 = dma.done.wait [#allocation4], 64  }
0x15fd   :  { %1889 = vsyncadd [#allocation4], 4294967232 }
0x15fe   :  { %1513 = vsyncpa [#allocation3], 1 }
0x15ff   :  { %1514 = vsyncpa [#allocation6], 1 }
0x1600   :  { %1515 = vsyncpa [#allocation4], 1 }

</bundles_post_ra>
